<compile_context>
chip_gen: v7x
topology: tpu7x:2x2x1
jax: 0.10.0
libtpu: 0.0.40
codegen_flags: <defaults>
</compile_context>

<pallas_src>
import functools

import jax
import jax.numpy as jnp
from jax.experimental import pallas as pl
from jax.experimental.pallas import tpu as pltpu


def _encoder_lstm_kernel(*refs, hidden_dim, num_layers, seq_len, batch_pad):
    """Fused multi-layer LSTM over the full sequence in one kernel invocation.

    refs layout (inputs, outputs, scratch):
      refs[0]               x2d_ref (T*Bp, D0)   flattened time-major input
      refs[1 + 3*l + 0]     wih_ref (D_in_l, 4H)
      refs[1 + 3*l + 1]     whh_ref (H, 4H)
      refs[1 + 3*l + 2]     b_ref   (1, 4H)      (bias_ih + bias_hh)
      refs[1 + 3*L]         hN_ref  (L, Bp, H)   final hidden states
      refs[2 + 3*L]         cN_ref  (L, Bp, H)   final cell states
      scratch:
        gx_buf (T*Bp, 4H) f32   input-projection gates (hoisted matmul result)
        y_buf  (*, H)     f32   previous layer's per-timestep hidden output
    """
    H, L, T, Bp = hidden_dim, num_layers, seq_len, batch_pad
    x_ref = refs[0]
    hN_ref = refs[1 + 3 * L]
    cN_ref = refs[2 + 3 * L]
    gx_buf = refs[3 + 3 * L]
    y_buf = refs[4 + 3 * L]

    for layer in range(L):
        wih_ref = refs[1 + 3 * layer]
        whh_ref = refs[2 + 3 * layer]
        b_ref = refs[3 + 3 * layer]

        # ---- phase 1: input projection + bias for ALL timesteps at once (one big
        #               MXU matmul, off the serial critical path) ----
        xin = x_ref[...] if layer == 0 else y_buf[...]            # (T*Bp, D_in)
        gx_buf[...] = (jnp.dot(xin, wih_ref[...],
                               preferred_element_type=jnp.float32)
                       + b_ref[...])                              # (T*Bp, 4H)

        # ---- phase 2: serial recurrence; only h_{t-1} @ W_hh per step.
        #      h, c live in the fori_loop carry (registers), not VMEM scratch. ----
        whh = whh_ref[...]                                        # (H, 4H), loaded once
        write_y = layer < L - 1                                   # top layer's y unused

        def step(t, carry, whh=whh, write_y=write_y):
            h, c = carry
            row = pl.multiple_of(t * Bp, Bp)                      # sublane-aligned
            gates = (gx_buf[pl.ds(row, Bp), :]
                     + jnp.dot(h, whh,
                               preferred_element_type=jnp.float32))   # (Bp, 4H)
            i_g = jax.nn.sigmoid(gates[:, 0 * H:1 * H])
            f_g = jax.nn.sigmoid(gates[:, 1 * H:2 * H])
            g_g = jnp.tanh(gates[:, 2 * H:3 * H])
            o_g = jax.nn.sigmoid(gates[:, 3 * H:4 * H])
            c_new = f_g * c + i_g * g_g
            h_new = o_g * jnp.tanh(c_new)
            if write_y:
                y_buf[pl.ds(row, Bp), :] = h_new
            return (h_new, c_new)

        zero = jnp.zeros((Bp, H), jnp.float32)
        h_fin, c_fin = jax.lax.fori_loop(0, T, step, (zero, zero))

        # Final states written ONCE per layer (not per timestep).
        hN_ref[layer] = h_fin
        cN_ref[layer] = c_fin


def _encoder_lstm_pallas(x2d, layer_params, seq_len, batch_pad, hidden_dim):
    """x2d: (T*Bp, D0) flattened time-major, batch already padded to Bp (mult of 8)."""
    L = len(layer_params)
    H = hidden_dim
    Bp = batch_pad
    T = seq_len
    TB, D0 = x2d.shape

    kernel = functools.partial(_encoder_lstm_kernel, hidden_dim=H,
                               num_layers=L, seq_len=T, batch_pad=Bp)

    in_arrays = [x2d]
    in_specs = [pl.BlockSpec((TB, D0), lambda i: (0, 0))]
    for p in layer_params:
        wih = p["w_ih_t"]                      # (D_in, 4H)
        whh = p["w_hh_t"]                      # (H, 4H)
        b2d = p["bias"].reshape(1, 4 * H)      # (1, 4H)
        d_in = wih.shape[0]
        in_arrays += [wih, whh, b2d]
        in_specs += [
            pl.BlockSpec((d_in, 4 * H), lambda i: (0, 0)),
            pl.BlockSpec((H, 4 * H), lambda i: (0, 0)),
            pl.BlockSpec((1, 4 * H), lambda i: (0, 0)),
        ]

    # y_buf only needed when there is a layer above layer 0.
    y_rows = TB if L > 1 else 8

    # TODO(synk): for very large T*B*H working sets (>~16-32 MiB scoped VMEM, esp.
    # v7x's 64 MiB physical VMEM), tile the batch with a "parallel" grid axis and
    # set vmem_limit_bytes explicitly.
    hN, cN = pl.pallas_call(
        kernel,
        out_shape=(
            jax.ShapeDtypeStruct((L, Bp, H), jnp.float32),
            jax.ShapeDtypeStruct((L, Bp, H), jnp.float32),
        ),
        grid_spec=pltpu.PrefetchScalarGridSpec(
            num_scalar_prefetch=0,
            grid=(1,),                                       # single invocation
            in_specs=in_specs,
            out_specs=[
                pl.BlockSpec((L, Bp, H), lambda i: (0, 0, 0)),
                pl.BlockSpec((L, Bp, H), lambda i: (0, 0, 0)),
            ],
            scratch_shapes=[
                pltpu.VMEM((TB, 4 * H), jnp.float32),        # gx_buf
                pltpu.VMEM((y_rows, H), jnp.float32),        # y_buf
            ],
        ),
        compiler_params=pltpu.CompilerParams(
            dimension_semantics=("arbitrary",)),
    )(*in_arrays)
    return hN, cN


def init_lstm_params(key, input_size, hidden_dim, num_layers):
    """Deterministic params matching nn.LSTM(input_size, hidden_dim, num_layers)."""
    params = []
    bound = 1.0 / jnp.sqrt(hidden_dim)
    for layer in range(num_layers):
        d_in = input_size if layer == 0 else hidden_dim
        key, k1, k2, k3, k4 = jax.random.split(key, 5)
        w_ih = jax.random.uniform(k1, (4 * hidden_dim, d_in), jnp.float32, -bound, bound)
        w_hh = jax.random.uniform(k2, (4 * hidden_dim, hidden_dim), jnp.float32, -bound, bound)
        b_ih = jax.random.uniform(k3, (4 * hidden_dim,), jnp.float32, -bound, bound)
        b_hh = jax.random.uniform(k4, (4 * hidden_dim,), jnp.float32, -bound, bound)
        params.append({
            "w_ih_t": w_ih.T,              # (d_in, 4H)
            "w_hh_t": w_hh.T,              # (H, 4H)
            "bias": b_ih + b_hh,           # (4H,)
        })
    return params


def encoder_lstm_forward(x, params, hidden_dim, num_layers):
    """Pallas implementation of EncoderLSTM.forward.

    x: (B, T, F) batch-first, F >= 2.  The (h, c) args of the PyTorch forward are
    ignored there (it builds fresh zero states), so they are omitted here.
    Returns ([hn1], [cn1]) with hn1, cn1 of shape (num_layers, B, hidden_dim).
    """
    x0 = x[:, -480:, 0:2]                                   # (B, T', 2)
    B, T, D0 = x0.shape
    Bp = ((B + 7) // 8) * 8                                 # pad batch to sublane tile

    xt = jnp.transpose(x0, (1, 0, 2)).astype(jnp.float32)   # time-major (T, B, 2)
    if Bp != B:
        xt = jnp.pad(xt, ((0, 0), (0, Bp - B), (0, 0)))
    x2d = xt.reshape(T * Bp, D0)                            # flattened, sublane-aligned

    hN, cN = _encoder_lstm_pallas(x2d, params, T, Bp, hidden_dim)
    hn1 = hN[:, :B, :]                                      # (L, B, H)
    cn1 = cN[:, :B, :]
    return [hn1], [cn1]


def _reference_lstm(x, params, hidden_dim, num_layers):
    """Pure-JAX reference (lax.scan) mirroring PyTorch nn.LSTM semantics."""
    x0 = x[:, -480:, 0:2].astype(jnp.float32)
    layer_in = jnp.transpose(x0, (1, 0, 2))                 # (T, B, D)
    B = layer_in.shape[1]
    h_fs, c_fs = [], []
    for layer in range(num_layers):
        p = params[layer]

        def step(carry, x_t, p=p):
            h, c = carry
            gates = x_t @ p["w_ih_t"] + h @ p["w_hh_t"] + p["bias"]
            H = hidden_dim
            i = jax.nn.sigmoid(gates[:, :H])
            f = jax.nn.sigmoid(gates[:, H:2 * H])
            g = jnp.tanh(gates[:, 2 * H:3 * H])
            o = jax.nn.sigmoid(gates[:, 3 * H:])
            c_new = f * c + i * g
            h_new = o * jnp.tanh(c_new)
            return (h_new, c_new), h_new

        init = (jnp.zeros((B, hidden_dim), jnp.float32),
                jnp.zeros((B, hidden_dim), jnp.float32))
        (h_T, c_T), ys = jax.lax.scan(step, init, layer_in)
        h_fs.append(h_T)
        c_fs.append(c_T)
        layer_in = ys
    return jnp.stack(h_fs, 0), jnp.stack(c_fs, 0)


if __name__ == "__main__":
    # Small, forward-consistent shapes: batch=2, seq=8 (<480 -> full seq kept),
    # feature dim 4 (only first 2 used), hidden=32, layers=2.
    B, T, F = 2, 8, 4
    HIDDEN_DIM = 32
    NUM_LAYERS = 2

    key = jax.random.PRNGKey(0)
    key, kx = jax.random.split(key)
    x = jax.random.normal(kx, (B, T, F), dtype=jnp.float32)

    params = init_lstm_params(key, input_size=2, hidden_dim=HIDDEN_DIM,
                              num_layers=NUM_LAYERS)

    (hn_list, cn_list) = encoder_lstm_forward(x, params, HIDDEN_DIM, NUM_LAYERS)
    hn1 = jax.block_until_ready(hn_list[0])
    cn1 = jax.block_until_ready(cn_list[0])

    # Sanity-check against a pure-JAX reference.
    hn_ref, cn_ref = _reference_lstm(x, params, HIDDEN_DIM, NUM_LAYERS)
    assert hn1.shape == (NUM_LAYERS, B, HIDDEN_DIM)
    assert cn1.shape == (NUM_LAYERS, B, HIDDEN_DIM)
    assert jnp.allclose(hn1, hn_ref, atol=1e-4, rtol=1e-4)
    assert jnp.allclose(cn1, cn_ref, atol=1e-4, rtol=1e-4)

    print("KERNEL_OK")
</pallas_src>

<mosaic_0001>
module attributes {stable_mosaic.version = 11 : i64} {
  func.func @_encoder_lstm_kernel(%arg0: i32, %arg1: memref<64x2xf32, #tpu.memory_space<vmem>>, %arg2: memref<2x128xf32, #tpu.memory_space<vmem>>, %arg3: memref<32x128xf32, #tpu.memory_space<vmem>>, %arg4: memref<1x128xf32, #tpu.memory_space<vmem>>, %arg5: memref<32x128xf32, #tpu.memory_space<vmem>>, %arg6: memref<32x128xf32, #tpu.memory_space<vmem>>, %arg7: memref<1x128xf32, #tpu.memory_space<vmem>>, %arg8: memref<2x8x32xf32, #tpu.memory_space<vmem>>, %arg9: memref<2x8x32xf32, #tpu.memory_space<vmem>>, %arg10: memref<64x128xf32, #tpu.memory_space<vmem>>, %arg11: memref<64x32xf32, #tpu.memory_space<vmem>>) attributes {dimension_semantics = [#tpu.dimension_semantics<arbitrary>], iteration_bounds = array<i64: 1>, scalar_prefetch = 0 : i64, scratch_operands = 2 : i64, tpu.core_type = #tpu.core_type<tc>, window_params = [{pipeline_mode = #tpu.pipeline_mode<synchronous>, transform_indices = @transform_0, window_bounds = array<i64: 64, 2>}, {pipeline_mode = #tpu.pipeline_mode<synchronous>, transform_indices = @transform_1, window_bounds = array<i64: 2, 128>}, {pipeline_mode = #tpu.pipeline_mode<synchronous>, transform_indices = @transform_2, window_bounds = array<i64: 32, 128>}, {pipeline_mode = #tpu.pipeline_mode<synchronous>, transform_indices = @transform_3, window_bounds = array<i64: 1, 128>}, {pipeline_mode = #tpu.pipeline_mode<synchronous>, transform_indices = @transform_4, window_bounds = array<i64: 32, 128>}, {pipeline_mode = #tpu.pipeline_mode<synchronous>, transform_indices = @transform_5, window_bounds = array<i64: 32, 128>}, {pipeline_mode = #tpu.pipeline_mode<synchronous>, transform_indices = @transform_6, window_bounds = array<i64: 1, 128>}, {pipeline_mode = #tpu.pipeline_mode<synchronous>, transform_indices = @transform_7, window_bounds = array<i64: 2, 8, 32>}, {pipeline_mode = #tpu.pipeline_mode<synchronous>, transform_indices = @transform_8, window_bounds = array<i64: 2, 8, 32>}]} {
    %c0 = arith.constant 0 : index
    %c0_0 = arith.constant 0 : index
    %0 = vector.load %arg1[%c0, %c0_0] : memref<64x2xf32, #tpu.memory_space<vmem>>, vector<64x2xf32>
    %c0_1 = arith.constant 0 : index
    %c0_2 = arith.constant 0 : index
    %1 = vector.load %arg2[%c0_1, %c0_2] : memref<2x128xf32, #tpu.memory_space<vmem>>, vector<2x128xf32>
    %cst = arith.constant dense<0.000000e+00> : vector<64x128xf32>
    %2 = tpu.matmul %0, %1, %cst {dimension_numbers = #tpu.dot_dimension_numbers<[1], [0], [0], [1], [0, 0, 1, 1], [], []>} : vector<64x2xf32>, vector<2x128xf32>, vector<64x128xf32> -> vector<64x128xf32>
    %c0_3 = arith.constant 0 : index
    %c0_4 = arith.constant 0 : index
    %3 = vector.load %arg4[%c0_3, %c0_4] : memref<1x128xf32, #tpu.memory_space<vmem>>, vector<1x128xf32>
    %4 = vector.broadcast %3 : vector<1x128xf32> to vector<64x128xf32>
    %5 = arith.addf %2, %4 : vector<64x128xf32>
    %c0_5 = arith.constant 0 : index
    %c0_6 = arith.constant 0 : index
    %6 = vector.load %arg10[%c0_5, %c0_6] : memref<64x128xf32, #tpu.memory_space<vmem>>, vector<64x128xf32>
    tpu.vector_store %arg10[%c0_5, %c0_6], %5 {strides = array<i32>} : memref<64x128xf32, #tpu.memory_space<vmem>>, vector<64x128xf32>,
    %c0_7 = arith.constant 0 : index
    %c0_8 = arith.constant 0 : index
    %7 = vector.load %arg3[%c0_7, %c0_8] : memref<32x128xf32, #tpu.memory_space<vmem>>, vector<32x128xf32>
    %cst_9 = arith.constant 0.000000e+00 : f32
    %8 = vector.broadcast %cst_9 : f32 to vector<8x32xf32>
    %c0_i32 = arith.constant 0 : i32
    %c8_i32 = arith.constant 8 : i32
    %9 = arith.addi %c0_i32, %c8_i32 : i32
    %c1_i32 = arith.constant 1 : i32
    %10:2 = scf.for %arg12 = %c0_i32 to %9 step %c1_i32 iter_args(%arg13 = %8, %arg14 = %8) -> (vector<8x32xf32>, vector<8x32xf32>)  : i32 {
      %c8_i32_38 = arith.constant 8 : i32
      %34 = arith.muli %arg12, %c8_i32_38 : i32
      %35 = tpu.assume_multiple %34, 8 : i32
      %36 = arith.index_cast %35 : i32 to index
      %c0_39 = arith.constant 0 : index
      %37 = vector.load %arg10[%36, %c0_39] : memref<64x128xf32, #tpu.memory_space<vmem>>, vector<8x128xf32>
      %cst_40 = arith.constant dense<0.000000e+00> : vector<8x128xf32>
      %38 = tpu.matmul %arg13, %7, %cst_40 {dimension_numbers = #tpu.dot_dimension_numbers<[1], [0], [0], [1], [0, 0, 1, 1], [], []>} : vector<8x32xf32>, vector<32x128xf32>, vector<8x128xf32> -> vector<8x128xf32>
      %39 = arith.addf %37, %38 : vector<8x128xf32>
      %40 = vector.extract_strided_slice %39 {offsets = [0, 0], sizes = [8, 32], strides = [1, 1]} : vector<8x128xf32> to vector<8x32xf32>
      %41 = arith.negf %40 : vector<8x32xf32>
      %42 = math.exp %41 : vector<8x32xf32>
      %cst_41 = arith.constant 1.000000e+00 : f32
      %43 = vector.broadcast %cst_41 : f32 to vector<8x32xf32>
      %44 = arith.addf %43, %42 : vector<8x32xf32>
      %45 = arith.divf %43, %44 : vector<8x32xf32>
      %46 = vector.extract_strided_slice %39 {offsets = [0, 32], sizes = [8, 32], strides = [1, 1]} : vector<8x128xf32> to vector<8x32xf32>
      %47 = arith.negf %46 : vector<8x32xf32>
      %48 = math.exp %47 : vector<8x32xf32>
      %cst_42 = arith.constant 1.000000e+00 : f32
      %49 = vector.broadcast %cst_42 : f32 to vector<8x32xf32>
      %50 = arith.addf %49, %48 : vector<8x32xf32>
      %51 = arith.divf %49, %50 : vector<8x32xf32>
      %52 = vector.extract_strided_slice %39 {offsets = [0, 64], sizes = [8, 32], strides = [1, 1]} : vector<8x128xf32> to vector<8x32xf32>
      %53 = math.tanh %52 : vector<8x32xf32>
      %54 = vector.extract_strided_slice %39 {offsets = [0, 96], sizes = [8, 32], strides = [1, 1]} : vector<8x128xf32> to vector<8x32xf32>
      %55 = arith.negf %54 : vector<8x32xf32>
      %56 = math.exp %55 : vector<8x32xf32>
      %cst_43 = arith.constant 1.000000e+00 : f32
      %57 = vector.broadcast %cst_43 : f32 to vector<8x32xf32>
      %58 = arith.addf %57, %56 : vector<8x32xf32>
      %59 = arith.divf %57, %58 : vector<8x32xf32>
      %60 = arith.mulf %51, %arg14 : vector<8x32xf32>
      %61 = arith.mulf %45, %53 : vector<8x32xf32>
      %62 = arith.addf %60, %61 : vector<8x32xf32>
      %63 = math.tanh %62 : vector<8x32xf32>
      %64 = arith.mulf %59, %63 : vector<8x32xf32>
      %65 = arith.index_cast %35 : i32 to index
      %c0_44 = arith.constant 0 : index
      %66 = vector.load %arg11[%65, %c0_44] : memref<64x32xf32, #tpu.memory_space<vmem>>, vector<8x32xf32>
      tpu.vector_store %arg11[%65, %c0_44], %64 {strides = array<i32>} : memref<64x32xf32, #tpu.memory_space<vmem>>, vector<8x32xf32>,
      scf.yield %64, %62 : vector<8x32xf32>, vector<8x32xf32>
    }
    %c8_i32_10 = arith.constant 8 : i32
    %c0_11 = arith.constant 0 : index
    %c0_12 = arith.constant 0 : index
    %c0_13 = arith.constant 0 : index
    %11 = vector.load %arg8[%c0_11, %c0_12, %c0_13] : memref<2x8x32xf32, #tpu.memory_space<vmem>>, vector<1x8x32xf32>
    %12 = vector.shape_cast %11 : vector<1x8x32xf32> to vector<8x32xf32>
    %13 = vector.shape_cast %10#0 : vector<8x32xf32> to vector<1x8x32xf32>
    tpu.vector_store %arg8[%c0_11, %c0_12, %c0_13], %13 {strides = array<i32>} : memref<2x8x32xf32, #tpu.memory_space<vmem>>, vector<1x8x32xf32>,
    %c0_14 = arith.constant 0 : index
    %c0_15 = arith.constant 0 : index
    %c0_16 = arith.constant 0 : index
    %14 = vector.load %arg9[%c0_14, %c0_15, %c0_16] : memref<2x8x32xf32, #tpu.memory_space<vmem>>, vector<1x8x32xf32>
    %15 = vector.shape_cast %14 : vector<1x8x32xf32> to vector<8x32xf32>
    %16 = vector.shape_cast %10#1 : vector<8x32xf32> to vector<1x8x32xf32>
    tpu.vector_store %arg9[%c0_14, %c0_15, %c0_16], %16 {strides = array<i32>} : memref<2x8x32xf32, #tpu.memory_space<vmem>>, vector<1x8x32xf32>,
    %c0_17 = arith.constant 0 : index
    %c0_18 = arith.constant 0 : index
    %17 = vector.load %arg11[%c0_17, %c0_18] : memref<64x32xf32, #tpu.memory_space<vmem>>, vector<64x32xf32>
    %c0_19 = arith.constant 0 : index
    %c0_20 = arith.constant 0 : index
    %18 = vector.load %arg5[%c0_19, %c0_20] : memref<32x128xf32, #tpu.memory_space<vmem>>, vector<32x128xf32>
    %cst_21 = arith.constant dense<0.000000e+00> : vector<64x128xf32>
    %19 = tpu.matmul %17, %18, %cst_21 {dimension_numbers = #tpu.dot_dimension_numbers<[1], [0], [0], [1], [0, 0, 1, 1], [], []>} : vector<64x32xf32>, vector<32x128xf32>, vector<64x128xf32> -> vector<64x128xf32>
    %c0_22 = arith.constant 0 : index
    %c0_23 = arith.constant 0 : index
    %20 = vector.load %arg7[%c0_22, %c0_23] : memref<1x128xf32, #tpu.memory_space<vmem>>, vector<1x128xf32>
    %21 = vector.broadcast %20 : vector<1x128xf32> to vector<64x128xf32>
    %22 = arith.addf %19, %21 : vector<64x128xf32>
    %c0_24 = arith.constant 0 : index
    %c0_25 = arith.constant 0 : index
    %23 = vector.load %arg10[%c0_24, %c0_25] : memref<64x128xf32, #tpu.memory_space<vmem>>, vector<64x128xf32>
    tpu.vector_store %arg10[%c0_24, %c0_25], %22 {strides = array<i32>} : memref<64x128xf32, #tpu.memory_space<vmem>>, vector<64x128xf32>,
    %c0_26 = arith.constant 0 : index
    %c0_27 = arith.constant 0 : index
    %24 = vector.load %arg6[%c0_26, %c0_27] : memref<32x128xf32, #tpu.memory_space<vmem>>, vector<32x128xf32>
    %cst_28 = arith.constant 0.000000e+00 : f32
    %25 = vector.broadcast %cst_28 : f32 to vector<8x32xf32>
    %c0_i32_29 = arith.constant 0 : i32
    %c8_i32_30 = arith.constant 8 : i32
    %26 = arith.addi %c0_i32_29, %c8_i32_30 : i32
    %c1_i32_31 = arith.constant 1 : i32
    %27:2 = scf.for %arg12 = %c0_i32_29 to %26 step %c1_i32_31 iter_args(%arg13 = %25, %arg14 = %25) -> (vector<8x32xf32>, vector<8x32xf32>)  : i32 {
      %c8_i32_38 = arith.constant 8 : i32
      %34 = arith.muli %arg12, %c8_i32_38 : i32
      %35 = tpu.assume_multiple %34, 8 : i32
      %36 = arith.index_cast %35 : i32 to index
      %c0_39 = arith.constant 0 : index
      %37 = vector.load %arg10[%36, %c0_39] : memref<64x128xf32, #tpu.memory_space<vmem>>, vector<8x128xf32>
      %cst_40 = arith.constant dense<0.000000e+00> : vector<8x128xf32>
      %38 = tpu.matmul %arg13, %24, %cst_40 {dimension_numbers = #tpu.dot_dimension_numbers<[1], [0], [0], [1], [0, 0, 1, 1], [], []>} : vector<8x32xf32>, vector<32x128xf32>, vector<8x128xf32> -> vector<8x128xf32>
      %39 = arith.addf %37, %38 : vector<8x128xf32>
      %40 = vector.extract_strided_slice %39 {offsets = [0, 0], sizes = [8, 32], strides = [1, 1]} : vector<8x128xf32> to vector<8x32xf32>
      %41 = arith.negf %40 : vector<8x32xf32>
      %42 = math.exp %41 : vector<8x32xf32>
      %cst_41 = arith.constant 1.000000e+00 : f32
      %43 = vector.broadcast %cst_41 : f32 to vector<8x32xf32>
      %44 = arith.addf %43, %42 : vector<8x32xf32>
      %45 = arith.divf %43, %44 : vector<8x32xf32>
      %46 = vector.extract_strided_slice %39 {offsets = [0, 32], sizes = [8, 32], strides = [1, 1]} : vector<8x128xf32> to vector<8x32xf32>
      %47 = arith.negf %46 : vector<8x32xf32>
      %48 = math.exp %47 : vector<8x32xf32>
      %cst_42 = arith.constant 1.000000e+00 : f32
      %49 = vector.broadcast %cst_42 : f32 to vector<8x32xf32>
      %50 = arith.addf %49, %48 : vector<8x32xf32>
      %51 = arith.divf %49, %50 : vector<8x32xf32>
      %52 = vector.extract_strided_slice %39 {offsets = [0, 64], sizes = [8, 32], strides = [1, 1]} : vector<8x128xf32> to vector<8x32xf32>
      %53 = math.tanh %52 : vector<8x32xf32>
      %54 = vector.extract_strided_slice %39 {offsets = [0, 96], sizes = [8, 32], strides = [1, 1]} : vector<8x128xf32> to vector<8x32xf32>
      %55 = arith.negf %54 : vector<8x32xf32>
      %56 = math.exp %55 : vector<8x32xf32>
      %cst_43 = arith.constant 1.000000e+00 : f32
      %57 = vector.broadcast %cst_43 : f32 to vector<8x32xf32>
      %58 = arith.addf %57, %56 : vector<8x32xf32>
      %59 = arith.divf %57, %58 : vector<8x32xf32>
      %60 = arith.mulf %51, %arg14 : vector<8x32xf32>
      %61 = arith.mulf %45, %53 : vector<8x32xf32>
      %62 = arith.addf %60, %61 : vector<8x32xf32>
      %63 = math.tanh %62 : vector<8x32xf32>
      %64 = arith.mulf %59, %63 : vector<8x32xf32>
      scf.yield %64, %62 : vector<8x32xf32>, vector<8x32xf32>
    }
    %c8_i32_32 = arith.constant 8 : i32
    %c1 = arith.constant 1 : index
    %c0_33 = arith.constant 0 : index
    %c0_34 = arith.constant 0 : index
    %28 = vector.load %arg8[%c1, %c0_33, %c0_34] : memref<2x8x32xf32, #tpu.memory_space<vmem>>, vector<1x8x32xf32>
    %29 = vector.shape_cast %28 : vector<1x8x32xf32> to vector<8x32xf32>
    %30 = vector.shape_cast %27#0 : vector<8x32xf32> to vector<1x8x32xf32>
    tpu.vector_store %arg8[%c1, %c0_33, %c0_34], %30 {strides = array<i32>} : memref<2x8x32xf32, #tpu.memory_space<vmem>>, vector<1x8x32xf32>,
    %c1_35 = arith.constant 1 : index
    %c0_36 = arith.constant 0 : index
    %c0_37 = arith.constant 0 : index
    %31 = vector.load %arg9[%c1_35, %c0_36, %c0_37] : memref<2x8x32xf32, #tpu.memory_space<vmem>>, vector<1x8x32xf32>
    %32 = vector.shape_cast %31 : vector<1x8x32xf32> to vector<8x32xf32>
    %33 = vector.shape_cast %27#1 : vector<8x32xf32> to vector<1x8x32xf32>
    tpu.vector_store %arg9[%c1_35, %c0_36, %c0_37], %33 {strides = array<i32>} : memref<2x8x32xf32, #tpu.memory_space<vmem>>, vector<1x8x32xf32>,
    return
  }
  func.func @transform_0(%arg0: i32) -> (i32, i32) {
    %c0_i32 = arith.constant 0 : i32
    %c0_i32_0 = arith.constant 0 : i32
    %c0_i32_1 = arith.constant 0 : i32
    return %c0_i32, %c0_i32_0 : i32, i32
  }
  func.func @transform_1(%arg0: i32) -> (i32, i32) {
    %c0_i32 = arith.constant 0 : i32
    %c0_i32_0 = arith.constant 0 : i32
    %c0_i32_1 = arith.constant 0 : i32
    return %c0_i32, %c0_i32_0 : i32, i32
  }
  func.func @transform_2(%arg0: i32) -> (i32, i32) {
    %c0_i32 = arith.constant 0 : i32
    %c0_i32_0 = arith.constant 0 : i32
    %c0_i32_1 = arith.constant 0 : i32
    return %c0_i32, %c0_i32_0 : i32, i32
  }
  func.func @transform_3(%arg0: i32) -> (i32, i32) {
    %c0_i32 = arith.constant 0 : i32
    %c0_i32_0 = arith.constant 0 : i32
    %c0_i32_1 = arith.constant 0 : i32
    return %c0_i32, %c0_i32_0 : i32, i32
  }
  func.func @transform_4(%arg0: i32) -> (i32, i32) {
    %c0_i32 = arith.constant 0 : i32
    %c0_i32_0 = arith.constant 0 : i32
    %c0_i32_1 = arith.constant 0 : i32
    return %c0_i32, %c0_i32_0 : i32, i32
  }
  func.func @transform_5(%arg0: i32) -> (i32, i32) {
    %c0_i32 = arith.constant 0 : i32
    %c0_i32_0 = arith.constant 0 : i32
    %c0_i32_1 = arith.constant 0 : i32
    return %c0_i32, %c0_i32_0 : i32, i32
  }
  func.func @transform_6(%arg0: i32) -> (i32, i32) {
    %c0_i32 = arith.constant 0 : i32
    %c0_i32_0 = arith.constant 0 : i32
    %c0_i32_1 = arith.constant 0 : i32
    return %c0_i32, %c0_i32_0 : i32, i32
  }
  func.func @transform_7(%arg0: i32) -> (i32, i32, i32) {
    %c0_i32 = arith.constant 0 : i32
    %c0_i32_0 = arith.constant 0 : i32
    %c0_i32_1 = arith.constant 0 : i32
    %c0_i32_2 = arith.constant 0 : i32
    return %c0_i32, %c0_i32_0, %c0_i32_1 : i32, i32, i32
  }
  func.func @transform_8(%arg0: i32) -> (i32, i32, i32) {
    %c0_i32 = arith.constant 0 : i32
    %c0_i32_0 = arith.constant 0 : i32
    %c0_i32_1 = arith.constant 0 : i32
    %c0_i32_2 = arith.constant 0 : i32
    return %c0_i32, %c0_i32_0, %c0_i32_1 : i32, i32, i32
  }
}

</mosaic_0001>

<bundles_post_ra>
// kernel: tpu_custom_call.1
= control target key start
LH: loop header
LB: loop body
LE: loop exit
PB: predicated region body
PF: predicated region fallthrough
CT: control target
= control target key end

     0   :  { %14 = vsyncpa [#allocation5], 0  ;;  %s1254_s0 = inlined_call_operand.vmem [shape: f32[64,2], index: 0, kind: input, shape index: {}]   ;;  %s1255_s1 = inlined_call_operand.vmem [shape: f32[2,128], index: 1, kind: input, shape index: {}]   ;;  %s1256_s2 = inlined_call_operand.vmem [shape: f32[32,128], index: 2, kind: input, shape index: {}]   ;;  %s1257_s3 = inlined_call_operand.vmem [shape: f32[1,128], index: 3, kind: input, shape index: {}]   ;;  %s1258_s4 = inlined_call_operand.vmem [shape: f32[32,128], index: 4, kind: input, shape index: {}]   ;;  %s1259_s5 = inlined_call_operand.hbm [shape: f32[32,128], index: 5, kind: input, shape index: {}]   ;;  %s1260_s6 = inlined_call_operand.vmem [shape: f32[1,128], index: 6, kind: input, shape index: {}]   ;;  %s1261_s7 = inlined_call_operand.hbm [shape: f32[2,8,32], index: 7, kind: output, shape index: {0}]   ;;  %s1262_s8 = inlined_call_operand.hbm [shape: f32[2,8,32], index: 8, kind: output, shape index: {1}]  }
   0x1   :  { %15 = vsyncpa [#allocation6], 0 }
   0x2   :  { %16 = vsyncpa [#allocation9], 0  ;;  %s1018_s27 = smov [#allocation4]   ;;  %s898_s9 = scalar_lea.hbm %s1259_s5, 512 }
   0x3   :  { %s32_s28 = sshll.u32 %s1018_s27, 4  ;;  %p899_p0 = scmp.ne.s32.totalorder %s1259_s5, %s898_s9  ;;  %s33_s28 = int_to_ptr.vmem [resolvable:$true] %s32_s28 }
   0x4   :  { %p902_p1 = scmp.lt.u32.totalorder %s898_s9, %s1259_s5 }
   0x6   :  { %p904_p2 = pnand %p902_p1, %p899_p0 }
   0x8   :  { %907 = shalt.err (!%p904_p2)
}
   0x9   :  { %s908_s14 = scalar_lea.vmem %s33_s28, 512  ;;  %p913_p4 = scmp.lt.s32.totalorder %s33_s28, %s33_s28 }
   0xa   :  { %p909_p3 = scmp.ne.s32.totalorder %s33_s28, %s908_s14  ;;  %p914_p5 = scmp.lt.s32.totalorder %s908_s14, %s908_s14 }
   0xc   :  { %p915_p6 = por %p914_p5, %p913_p4 }
   0xe   :  { %p916_p7 = pnand %p915_p6, %p909_p3 }
  0x10   :  { %919 = shalt.err (!%p916_p7)
}
  0x11   :  { %s1019_s15 = smov 128   ;;  %s1020_s16 = smov 8  }
  0x12   :  { %38 = dma.hbm_to_vmem [thread:$0]  %s1259_s5, 512, %s33_s28, [#allocation5], %s1019_s15, %s1019_s15, %s1020_s16  }
  0x13   :  { %988 = dma.done.wait [#allocation5], 512  }
  0x14   :  { %989 = vsyncadd [#allocation5], 4294966784  ;;  %vm85_vm0 = vcmask 1041408   ;;  %v1098_v0 = vld [vmem:[%s1256_s2] sm:$0xff]  ;;  %v1103_v1 = vld [vmem:[%s1256_s2 + $0x8] sm:$0xff]  ;;  %vm60_vm1 = vcmask 15360  }
  0x15   :  { %v1108_v2 = vld [vmem:[%s1256_s2 + $0x10] sm:$0xff]  ;;  %v1113_v3 = vld [vmem:[%s1256_s2 + $0x18] sm:$0xff]  ;;  %v52_v4 = vld [vmem:[%s1255_s1] sm:$0x3]  ;;  %v994_v30 = vmov 0.0   ;;  %v998_v31 = vmov 0.0  }
  0x16   :  { %v44_v5 = vld [vmem:[%s1254_s0] sm:$0xff]  ;;  %735 = vmatprep.subr.msk.mxu0 %vm85_vm0, %v52_v4  ;;  %811 = vmatprep.subr.msk.mxu1 %vm85_vm0, %v52_v4  ;;  %v45_v7 = vld [vmem:[%s1254_s0 + $0x8] sm:$0xff]  ;;  %v46_v9 = vld [vmem:[%s1254_s0 + $0x10] sm:$0xff] }
  0x17   :  { %v48_v6 = vld [vmem:[%s1254_s0 + $0x20] sm:$0xff]  ;;  %v49_v8 = vld [vmem:[%s1254_s0 + $0x28] sm:$0xff]  ;;  %736 = vmatpush3.msk.msra.mxu0 %vm85_vm0, %v52_v4  ;;  %812 = vmatpush3.msk.msra.mxu1 %vm85_vm0, %v52_v4  ;;  %v50_v10 = vld [vmem:[%s1254_s0 + $0x30] sm:$0xff] }
  0x18   :  { %737 = vmatprep.mubr.msk.f32.mxu0 %vm60_vm1, %v44_v5  ;;  %743 = vmatprep.mubr.msk.f32.mxu1 %vm60_vm1, %v48_v6  ;;  %v47_v11 = vld [vmem:[%s1254_s0 + $0x18] sm:$0xff]  ;;  %v679_v13 = vld [vmem:[%s1257_s3] ss:$0 sm:$0xff] }
  0x19   :  { %738 = vmatmul.mubr.msk.f32.vlgmr.msra.gmra.mrb[0].mxu0 %vm60_vm1, %v45_v7  ;;  %744 = vmatmul.mubr.msk.f32.vlgmr.msra.gmra.mrb[0].mxu1 %vm60_vm1, %v49_v8  ;;  %v51_v12 = vld [vmem:[%s1254_s0 + $0x38] sm:$0xff]  ;;  %s1153_s0 = smov 0  }
  0x1a   :  { %740 = vmatprep.mubr.msk.f32.mxu0 %vm60_vm1, %v46_v9  ;;  %746 = vmatprep.mubr.msk.f32.mxu1 %vm60_vm1, %v50_v10 }
  0x1d   :  { %741 = vmatmul.mubr.msk.f32.gmra.mrb[2].mxu0 %vm60_vm1, %v47_v11  ;;  %747 = vmatmul.mubr.msk.f32.gmra.mrb[2].mxu1 %vm60_vm1, %v51_v12 }
  0xec   :  { %v739_v14 = vpop.f32.mrb[0].mxu0  ;;  %v745_v15 = vpop.f32.mrb[0].mxu1 }
  0xed   :  { %v161_v16 = vadd.f32 %v739_v14, %v679_v13  ;;  %v181_v17 = vadd.f32 %v745_v15, %v679_v13  ;;  %v155_v18 = vpop.f32.mrb[1].mxu0  ;;  %v175_v19 = vpop.f32.mrb[1].mxu1 }
  0xee   :  { %v156_v20 = vadd.f32 %v679_v13, %v155_v18  ;;  %v176_v21 = vadd.f32 %v679_v13, %v175_v19 }
  0xef   :  { %195 = vst [vmem:[#allocation2 + $0x8] sm:$0xff] %v161_v16  ;;  %199 = vst [vmem:[#allocation2 + $0x28] sm:$0xff] %v181_v17 }
  0xf0   :  { %194 = vst [vmem:[#allocation2] sm:$0xff] %v156_v20  ;;  %198 = vst [vmem:[#allocation2 + $0x20] sm:$0xff] %v176_v21  ;;  %v742_v22 = vpop.f32.mrb[2].mxu0  ;;  %v748_v23 = vpop.f32.mrb[2].mxu1 }
  0xf1   :  { %v171_v24 = vadd.f32 %v742_v22, %v679_v13  ;;  %v191_v25 = vadd.f32 %v748_v23, %v679_v13  ;;  %v165_v26 = vpop.f32.mrb[3].mxu0  ;;  %v185_v27 = vpop.f32.mrb[3].mxu1 }
  0xf2   :  { %v166_v28 = vadd.f32 %v679_v13, %v165_v26  ;;  %v186_v29 = vadd.f32 %v679_v13, %v185_v27 }
  0xf3   :  { %197 = vst [vmem:[#allocation2 + $0x18] sm:$0xff] %v171_v24  ;;  %201 = vst [vmem:[#allocation2 + $0x38] sm:$0xff] %v191_v25 }
  0xf4   :  { %196 = vst [vmem:[#allocation2 + $0x10] sm:$0xff] %v166_v28  ;;  %200 = vst [vmem:[#allocation2 + $0x30] sm:$0xff] %v186_v29 }
  0xf5 LB: > { %v792_v32 = vpack.c.bf16 %v1103_v1, %v1098_v0  ;;  %v1021_v33 = vmov 0.0|0.0   ;;  %s1022_s3 = smov 32   ;;  %v795_v34 = vpack.c.bf16 %v1113_v3, %v1108_v2  ;;  %vm1023_vm2 = vmmov 0   ;;  %s689_s24 = sshll.u32 %s1004_s0, 3  ;;  %s1004_s0 = sphi %s1153_s0, %s211_s0   ;;  %v1000_v31 = vphi %v998_v31, %v999_v31   ;;  %v996_v30 = vphi %v994_v30, %v995_v30  }
  0xf6   : > { %791 = vmatprep.subr.bf16.mxu0 %v1021_v33  ;;  %218 = vrot.lane.b32.xlu0 %v1000_v31, %s1022_s3  ;;  %v1024_v35 = vmov 0.0   ;;  %vm220_vm3 = vcmask 261120   ;;  %s215_s25 = scalar_lea.vmem [#allocation2], %s689_s24  ;;  %s1025_s5 = smov 64  }
  0xf7   : > { %793 = vmatpush3.bf16.msra.mxu0 %v792_v32  ;;  %757 = vmatprep.mubr.msk.f32.mxu0 %vm1023_vm2, %v1024_v35  ;;  %s322_s26 = scalar_lea.vmem [#allocation3], %s689_s24  ;;  %s211_s0 = sadd.s32 1, %s1004_s0  }
  0xf8   : > { %794 = vmatprep.subr.bf16.mxu0 %v1021_v33  ;;  %p208_p8 = scmp.ge.s32.totalorder %s211_s0, 8  }
  0xf9   :  { %v343_v55 = vld [vmem:[%s1258_s4] sm:$0xff] (%p208_p8)  ;;  %v344_v56 = vld [vmem:[%s1258_s4 + $0x8] sm:$0xff] (%p208_p8)  ;;  %v345_v57 = vld [vmem:[%s1258_s4 + $0x10] sm:$0xff] (%p208_p8)  ;;  %s1026_s12 = smov (%p208_p8), 32   ;;  %s1027_s1 = smov (%p208_p8), 96   ;;  %v1006_v28 = vmov (%p208_p8), 0.0  }
  0xfa   :  { %v797_v58 = vpack.c.bf16 (%p208_p8), %v344_v56, %v343_v55  ;;  %v346_v59 = vld [vmem:[%s1258_s4 + $0x18] sm:$0xff] (%p208_p8)  ;;  %v1193_v5 = vld [vmem:[#allocation4] sm:$0xff] (%p208_p8)  ;;  %v1195_v6 = vld [vmem:[#allocation4 + $0x8] sm:$0xff] (%p208_p8)  ;;  %v1010_v29 = vmov (%p208_p8), 0.0  }
  0xfb   : > { %796 = vmatpush3.bf16.msra.mxu0 %v795_v34  ;;  %v216_v37 = vld [vmem:[%s215_s25] sm:$0xff]  ;;  %v801_v62 = vpack.c.bf16 (%p208_p8), %v346_v59, %v345_v57  ;;  %v1197_v7 = vld [vmem:[#allocation4 + $0x10] sm:$0xff] (%p208_p8)  ;;  %v1199_v8 = vld [vmem:[#allocation4 + $0x18] sm:$0xff] (%p208_p8) }
  0xfc   :  { %798 = vmatprep.subr.bf16.mxu0 (%p208_p8), %v797_v58  ;;  %813 = vmatprep.subr.bf16.mxu1 (%p208_p8), %v797_v58  ;;  %v692_v11 = vld [vmem:[%s1260_s6] ss:$0 sm:$0xff] (%p208_p8)  ;;  %s1206_s6 = smov (%p208_p8), 0  }
  0xfd   :  { %815 = vmatpush3.bf16.msra.mxu1 (%p208_p8), %v797_v58 }
  0xfe   :  { %814 = vmatprep.subr.bf16.mxu1 (%p208_p8), %v801_v62 }
 0x101   :  { %816 = vmatpush3.bf16.msra.mxu1 (%p208_p8), %v801_v62 }
 0x168   : > { %v219_v36 = vpop.permute.xlu0 %218 }
 0x169   : > { %758 = vmatmul.mubr.msk.f32.vlgmr.msra.gmra.mrb[0].mxu0 %vm220_vm3, %v219_v36 }
 0x16a   :  { %800 = vmatpush3.bf16.msra.mxu0 (%p208_p8), %v797_v58 }
 0x16b   :  { %802 = vmatprep.subr.bf16.mxu0 (%p208_p8), %v801_v62 }
 0x16e   :  { %804 = vmatpush3.bf16.msra.mxu0 (%p208_p8), %v801_v62 }
 0x23c   : > { %v289_v38 = vpop.f32.mrb[0].mxu0 }
 0x23d   : > { %v293_v39 = vadd.f32 %v289_v38, %v216_v37  ;;  %v759_v40 = vpop.f32.mrb[1].mxu0 }
 0x23f   : > { %882 = vtanh.f32 %v293_v39  ;;  %v691_v42 = vmul.f32 -1.442695, %v293_v39 }
 0x241   : > { %884 = vpow2.f32 %v691_v42 }
 0x249   : > { %v883_v41 = vpop.eup %882 }
 0x24a   : > { %303 = vrot.lane.b32.xlu0 %v883_v41, %s1025_s5 }
 0x24b   : > { %v885_v43 = vpop.eup %884 }
 0x24c   : > { %v297_v44 = vadd.f32 1.0, %v885_v43 }
 0x24e   : > { %886 = vrcp.f32 %v297_v44 }
 0x258   : > { %v887_v45 = vpop.eup %886 }
 0x259   : > { %v301_v48 = vmul.f32 %v996_v30, %v887_v45 }
 0x2bc   : > { %v304_v46 = vpop.permute.xlu0 %303 }
 0x2bd   : > { %v306_v47 = vmul.f32 %v887_v45, %v304_v46 }
 0x2bf   : > { %308 = vrot.lane.b32.xlu1 %v306_v47, %s1022_s3 }
 0x331   : > { %v309_v49 = vpop.permute.xlu1 %308 }
 0x332   : > { %v311_v50 = vadd.f32 %v309_v49, %v301_v48  }
 0x334   : > { %888 = vtanh.f32 %v311_v50  ;;  %v995_v30 = vmov %v311_v50  }
 0x33e   : > { %v889_v51 = vpop.eup %888 }
 0x33f   : > { %314 = vrot.lane.b32.xlu1 %v889_v51, %s1025_s5 }
 0x3b1   : > { %v315_v52 = vpop.permute.xlu1 %314 }
 0x3b2   : > { %v317_v53 = vmul.f32 %v887_v45, %v315_v52  }
 0x3b4   : > { %319 = vrot.lane.b32.xlu0 %v317_v53, %s1022_s3  ;;  %v999_v31 = vmov %v317_v53  }
 0x3b8   :  { %325 = vrot.lane.b32.xlu0 (%p208_p8), %v317_v53, %s1026_s12 }
 0x3bc   :  { %331 = vrot.lane.b32.xlu0 (%p208_p8), %v311_v50, %s1027_s1 }
 0x421   :  { %210 = sbr.rel (!%p208_p8) target bundleno = 245 (0xf5), region = 79 }
 0x426   : > { %v320_v54 = vpop.permute.xlu0 %319 }
 0x427   : > { %323 = vst.msk [vmem:[%s322_s26] sm:$0xff] %vm220_vm3, %v320_v54 }
 0x42a   :  { %v326_v9 = vpop.permute.xlu0 %325 }
 0x42b   :  { %329 = vst.msk [vmem:[#allocation7] sm:$0xff] %vm220_vm3, %v326_v9 }
 0x42e   :  { %v335_v60 = vld [vmem:[#allocation3] sm:$0xff]  ;;  %v336_v63 = vld [vmem:[#allocation3 + $0x8] sm:$0xff]  ;;  %v337_v1 = vld [vmem:[#allocation3 + $0x10] sm:$0xff]  ;;  %v332_v10 = vpop.permute.xlu0 %331 }
 0x42f   :  { %v339_v61 = vld [vmem:[#allocation3 + $0x20] sm:$0xff]  ;;  %768 = vmatprep.mubr.msk.f32.mxu0 %vm220_vm3, %v335_v60  ;;  %v340_v0 = vld [vmem:[#allocation3 + $0x28] sm:$0xff]  ;;  %v341_v2 = vld [vmem:[#allocation3 + $0x30] sm:$0xff]  ;;  %334 = vst.msk [vmem:[#allocation8] sm:$0xff] %vm220_vm3, %v332_v10 }
 0x430   :  { %774 = vmatprep.mubr.msk.f32.mxu1 %vm220_vm3, %v339_v61  ;;  %769 = vmatmul.mubr.msk.f32.vlgmr.msra.gmra.mrb[0].mxu0 %vm220_vm3, %v336_v63  ;;  %v338_v3 = vld [vmem:[#allocation3 + $0x18] sm:$0xff] }
 0x431   :  { %775 = vmatmul.mubr.msk.f32.vlgmr.msra.gmra.mrb[0].mxu1 %vm220_vm3, %v340_v0  ;;  %771 = vmatprep.mubr.msk.f32.mxu0 %vm220_vm3, %v337_v1  ;;  %v342_v4 = vld [vmem:[#allocation3 + $0x38] sm:$0xff] }
 0x432   :  { %777 = vmatprep.mubr.msk.f32.mxu1 %vm220_vm3, %v341_v2 }
 0x434   :  { %772 = vmatmul.mubr.msk.f32.gmra.mrb[2].mxu0 %vm220_vm3, %v338_v3 }
 0x435   :  { %778 = vmatmul.mubr.msk.f32.gmra.mrb[2].mxu1 %vm220_vm3, %v342_v4 }
 0x503   :  { %v770_v12 = vpop.f32.mrb[0].mxu0 }
 0x504   :  { %v776_v13 = vpop.f32.mrb[0].mxu1  ;;  %v450_v14 = vadd.f32 %v770_v12, %v692_v11  ;;  %v444_v16 = vpop.f32.mrb[1].mxu0 }
 0x505   :  { %v470_v15 = vadd.f32 %v776_v13, %v692_v11  ;;  %v464_v17 = vpop.f32.mrb[1].mxu1  ;;  %v445_v18 = vadd.f32 %v692_v11, %v444_v16 }
 0x506   :  { %v465_v19 = vadd.f32 %v692_v11, %v464_v17  ;;  %484 = vst [vmem:[#allocation2 + $0x8] sm:$0xff] %v450_v14 }
 0x507   :  { %488 = vst [vmem:[#allocation2 + $0x28] sm:$0xff] %v470_v15  ;;  %483 = vst [vmem:[#allocation2] sm:$0xff] %v445_v18  ;;  %v773_v20 = vpop.f32.mrb[2].mxu0 }
 0x508   :  { %487 = vst [vmem:[#allocation2 + $0x20] sm:$0xff] %v465_v19  ;;  %v779_v21 = vpop.f32.mrb[2].mxu1  ;;  %v460_v22 = vadd.f32 %v773_v20, %v692_v11  ;;  %v454_v24 = vpop.f32.mrb[3].mxu0 }
 0x509   :  { %v480_v23 = vadd.f32 %v779_v21, %v692_v11  ;;  %v474_v25 = vpop.f32.mrb[3].mxu1  ;;  %v455_v26 = vadd.f32 %v692_v11, %v454_v24 }
 0x50a   :  { %v475_v27 = vadd.f32 %v692_v11, %v474_v25  ;;  %486 = vst [vmem:[#allocation2 + $0x18] sm:$0xff] %v460_v22 }
 0x50b   :  { %490 = vst [vmem:[#allocation2 + $0x38] sm:$0xff] %v480_v23  ;;  %485 = vst [vmem:[#allocation2 + $0x10] sm:$0xff] %v455_v26 }
 0x50c   :  { %489 = vst [vmem:[#allocation2 + $0x30] sm:$0xff] %v475_v27 }
 0x50d LB: > { %v806_v30 = vpack.c.bf16 %v1195_v6, %v1193_v5  ;;  %v1028_v31 = vmov 0.0|0.0   ;;  %s1029_s14 = smov 32   ;;  %v809_v32 = vpack.c.bf16 %v1199_v8, %v1197_v7  ;;  %vm1030_vm4 = vmmov 0   ;;  %s701_s17 = sshll.u32 %s1016_s6, 3  ;;  %s1016_s6 = sphi %s1206_s6, %s500_s6   ;;  %v1012_v29 = vphi %v1010_v29, %v1011_v29   ;;  %v1008_v28 = vphi %v1006_v28, %v1007_v28  }
 0x50e   : > { %805 = vmatprep.subr.bf16.mxu0 %v1028_v31  ;;  %507 = vrot.lane.b32.xlu0 %v1012_v29, %s1029_s14  ;;  %v1031_v33 = vmov 0.0   ;;  %s504_s18 = scalar_lea.vmem [#allocation2], %s701_s17  ;;  %s1032_s19 = smov 64  }
 0x50f   : > { %807 = vmatpush3.bf16.msra.mxu0 %v806_v30  ;;  %788 = vmatprep.mubr.msk.f32.mxu0 %vm1030_vm4, %v1031_v33  ;;  %s500_s6 = sadd.s32 1, %s1016_s6  }
 0x510   : > { %808 = vmatprep.subr.bf16.mxu0 %v1028_v31  ;;  %p497_p9 = scmp.ge.s32.totalorder %s500_s6, 8  }
 0x511   :  { %s1033_s20 = smov (%p497_p9), [#allocation7]   ;;  %s1034_s22 = smov (%p497_p9), [#allocation8]  }
 0x512   :  { %s623_s21 = sshll.u32 (%p497_p9), %s1033_s20, 4  ;;  %s635_s23 = sshll.u32 (%p497_p9), %s1034_s22, 4  ;;  %s624_s21 = int_to_ptr.vmem [resolvable:$true] %s623_s21  ;;  %s636_s23 = int_to_ptr.vmem [resolvable:$true] %s635_s23 }
 0x513   : > { %810 = vmatpush3.bf16.msra.mxu0 %v809_v32  ;;  %v505_v35 = vld [vmem:[%s504_s18] sm:$0xff]  ;;  %s920_s0 = scalar_lea.vmem (%p497_p9), %s624_s21, 256  ;;  %p925_p11 = scmp.lt.s32.totalorder (%p497_p9), %s624_s21, %s624_s21 }
 0x514   :  { %p921_p10 = scmp.ne.s32.totalorder (%p497_p9), %s624_s21, %s920_s0  ;;  %p926_p12 = scmp.lt.s32.totalorder (%p497_p9), %s920_s0, %s920_s0 }
 0x516   :  { %p927_p13 = por (%p497_p9), %p926_p12, %p925_p11 }
 0x518   :  { %p928_p0 = pnand (%p497_p9), %p927_p13, %p921_p10 }
 0x580   : > { %v508_v34 = vpop.permute.xlu0 %507 }
 0x581   : > { %789 = vmatmul.mubr.msk.f32.vlgmr.msra.gmra.mrb[0].mxu0 %vm220_vm3, %v508_v34 }
 0x654   : > { %v577_v36 = vpop.f32.mrb[0].mxu0 }
 0x655   : > { %v581_v37 = vadd.f32 %v577_v36, %v505_v35  ;;  %v790_v38 = vpop.f32.mrb[1].mxu0 }
 0x657   : > { %890 = vtanh.f32 %v581_v37  ;;  %v703_v40 = vmul.f32 -1.442695, %v581_v37 }
 0x659   : > { %892 = vpow2.f32 %v703_v40 }
 0x661   : > { %v891_v39 = vpop.eup %890 }
 0x662   : > { %591 = vrot.lane.b32.xlu0 %v891_v39, %s1032_s19 }
 0x663   : > { %v893_v41 = vpop.eup %892 }
 0x664   : > { %v585_v42 = vadd.f32 1.0, %v893_v41 }
 0x666   : > { %894 = vrcp.f32 %v585_v42 }
 0x670   : > { %v895_v43 = vpop.eup %894 }
 0x671   : > { %v589_v46 = vmul.f32 %v1008_v28, %v895_v43 }
 0x6d4   : > { %v592_v44 = vpop.permute.xlu0 %591 }
 0x6d5   : > { %v594_v45 = vmul.f32 %v895_v43, %v592_v44 }
 0x6d7   : > { %596 = vrot.lane.b32.xlu1 %v594_v45, %s1029_s14 }
 0x749   : > { %v597_v47 = vpop.permute.xlu1 %596 }
 0x74a   : > { %v599_v48 = vadd.f32 %v597_v47, %v589_v46  }
 0x74c   : > { %896 = vtanh.f32 %v599_v48  ;;  %v1007_v28 = vmov %v599_v48  }
 0x756   : > { %v897_v49 = vpop.eup %896 }
 0x757   : > { %602 = vrot.lane.b32.xlu1 %v897_v49, %s1032_s19 }
 0x7c6   :  { %499 = sbr.rel (!%p497_p9) target bundleno = 1293 (0x50d), region = 90 }
 0x7c9   : > { %v603_v50 = vpop.permute.xlu1 %602 }
 0x7ca   : > { %v605_v51 = vmul.f32 %v895_v43, %v603_v50  }
 0x7cc   : > { %v1011_v29 = vmov %v605_v51   ;;  %607 = vrot.lane.b32.xlu0 (%p497_p9), %v605_v51, %s1026_s12 }
 0x7d0   :  { %613 = vrot.lane.b32.xlu0 %v599_v48, %s1027_s1 }
 0x83e   :  { %v608_v52 = vpop.permute.xlu0 %607 }
 0x83f   :  { %611 = vst.msk [vmem:[#allocation7 + $0x8] sm:$0xff] %vm220_vm3, %v608_v52 }
 0x840   :  { %931 = shalt.err (!%p928_p0)
}
 0x841   :  { %s932_s25 = scalar_lea.hbm %s1261_s7, 256 }
 0x842   :  { %p933_p1 = scmp.ne.s32.totalorder %s1261_s7, %s932_s25  ;;  %p936_p2 = scmp.lt.u32.totalorder %s932_s25, %s1261_s7 }
 0x844   :  { %p938_p3 = pnand %p936_p2, %p933_p1 }
 0x846   :  { %941 = shalt.err (!%p938_p3)
}
 0x847   :  { %629 = dma.vmem_to_hbm [thread:$0]  %s624_s21, 256, %s1261_s7, [#allocation6], %s1019_s15, %s1019_s15, %s1020_s16   ;;  %v614_v53 = vpop.permute.xlu0 %613 }
 0x848   :  { %617 = vst.msk [vmem:[#allocation8 + $0x8] sm:$0xff] %vm220_vm3, %v614_v53  ;;  %s942_s9 = scalar_lea.vmem %s636_s23, 256  ;;  %p947_p5 = scmp.lt.s32.totalorder %s636_s23, %s636_s23 }
 0x849   :  { %p943_p4 = scmp.ne.s32.totalorder %s636_s23, %s942_s9  ;;  %p948_p6 = scmp.lt.s32.totalorder %s942_s9, %s942_s9 }
 0x84b   :  { %p949_p7 = por %p948_p6, %p947_p5 }
 0x84d   :  { %p950_p8 = pnand %p949_p7, %p943_p4 }
 0x84f   :  { %953 = shalt.err (!%p950_p8)
}
 0x850   :  { %s954_s2 = scalar_lea.hbm %s1262_s8, 256 }
 0x851   :  { %p955_p9 = scmp.ne.s32.totalorder %s1262_s8, %s954_s2  ;;  %p958_p10 = scmp.lt.u32.totalorder %s954_s2, %s1262_s8 }
 0x853   :  { %p960_p11 = pnand %p958_p10, %p955_p9 }
 0x855   :  { %963 = shalt.err (!%p960_p11)
}
 0x856   :  { %641 = dma.vmem_to_hbm [thread:$0]  %s636_s23, 256, %s1262_s8, [#allocation9], %s1019_s15, %s1019_s15, %s1020_s16  }
 0x857   :  { %990 = dma.done.wait [#allocation6], 256  }
 0x858   :  { %991 = vsyncadd [#allocation6], 4294967040 }
 0x859   :  { %992 = dma.done.wait [#allocation9], 256  }
 0x85a   :  { %993 = vsyncadd [#allocation9], 4294967040 }
 0x85b   :  { %648 = vsyncpa [#allocation5], 1 }
 0x85c   :  { %649 = vsyncpa [#allocation6], 1 }
 0x85d   :  { %650 = vsyncpa [#allocation9], 1 }

</bundles_post_ra>
